<compile_context>
chip_gen: v7x
topology: tpu7x:2x2x1
jax: 0.10.0
libtpu: 0.0.40
codegen_flags: <defaults>
</compile_context>

<pallas_src>
import functools

import numpy as np
import jax
import jax.numpy as jnp
from jax import lax
from jax.experimental import pallas as pl
from jax.experimental.pallas import tpu as pltpu


# -----------------------------------------------------------------------------
# Kernel 1: modulation (run once).
#   gamma' = (w @ Wg.T) * gain * ln_weight
#   beta'  = (w @ Wg.T) * gain * ln_bias + (w @ Wb.T) * gain
# -----------------------------------------------------------------------------
def _modulation_kernel(w_ref, wg_ref, wb_ref, ln_w_ref, ln_b_ref,
                       gamma_ref, beta_ref, *, gain):
    wv = w_ref[...]                                   # (B, D), native dtype
    # Transposed contraction on the MXU (contract dim 1 with dim 1 == w @ W.T);
    # no transposed copies are materialized.  Two dots share one pallas_call so
    # there is a single launch / weight-fetch phase.
    dn = (((1,), (1,)), ((), ()))
    gamma = lax.dot_general(wv, wg_ref[...].astype(wv.dtype), dn,
                            preferred_element_type=jnp.float32) * gain
    beta = lax.dot_general(wv, wb_ref[...].astype(wv.dtype), dn,
                           preferred_element_type=jnp.float32) * gain
    lw = ln_w_ref[...]                                # (1, D) f32
    lb = ln_b_ref[...]                                # (1, D) f32
    gamma_ref[...] = gamma * lw                       # fold LayerNorm weight
    beta_ref[...] = gamma * lb + beta                 # fold LayerNorm bias


# -----------------------------------------------------------------------------
# Kernel 2: streaming LayerNorm + per-batch affine modulation.
#   hidden_ref/out_ref: (TN, D)   gamma'/beta': (1, D)
# -----------------------------------------------------------------------------
def _sln_kernel(hidden_ref, gamma_ref, beta_ref, out_ref, *, eps, inv_d):
    h = hidden_ref[...].astype(jnp.float32)           # (TN, D)

    # Single-pass mean/variance: one read of the tile produces both reductions.
    s1 = jnp.sum(h, axis=-1, keepdims=True)           # (TN, 1)
    s2 = jnp.sum(h * h, axis=-1, keepdims=True)       # (TN, 1)
    mean = s1 * inv_d
    var = s2 * inv_d - mean * mean                    # biased var (torch LayerNorm)
    inv = lax.rsqrt(var + eps)

    g = gamma_ref[...]                                # (1, D) -> broadcast over TN
    b = beta_ref[...]
    out_ref[...] = ((h - mean) * inv * g + b).astype(out_ref.dtype)


def _tpu_config():
    """Per-generation (block_n, vmem_limit_bytes, pipeline_buffers)."""
    kind = ""
    try:
        kind = jax.devices()[0].device_kind.lower()
    except Exception:
        pass
    if "v7" in kind or "tpu7" in kind or "7x" in kind:
        # v7x: 64 MiB physical VMEM, ~3.2 TB/s HBM -> bigger tiles amortize the
        # ~0.35us step overhead, but stay well inside 64 MiB; 3-deep buffering
        # hides DMA issue latency on the short steps.
        return 1024, 48 * 1024 * 1024, 3
    if ("v5e" in kind or "v5 lite" in kind or "v5lite" in kind or "v6" in kind):
        # v5e / v6e: 128 MiB physical VMEM -> larger tiles are a free win.
        return 2048, 96 * 1024 * 1024, 2
    # Unknown generation: conservative.
    return 1024, 48 * 1024 * 1024, 2


def _hidden_block_spec(tn, d, n_buffers):
    shape = (pl.Squeezed(), tn, d)
    idx = lambda b, j: (b, j, 0)
    if n_buffers > 2:
        try:
            return pl.BlockSpec(shape, idx, pipeline_mode=pl.Buffered(n_buffers))
        except TypeError:
            pass  # older jax without pipeline_mode: fall back to default 2-deep
    return pl.BlockSpec(shape, idx)


def sln_forward(hidden, w, wg, wb, ln_weight, ln_bias, *, eps=1e-5, block_n=None):
    """hidden: [B, N, D], w: [B, D], wg/wb: [D, D], ln_weight/ln_bias: [D]."""
    B, N, D = hidden.shape
    assert w.shape == (B, D) and wg.shape == (D, D) and wb.shape == (D, D)
    gain = float(1.0 / np.sqrt(D))                    # weight_gain (lr_multiplier=1)

    max_tn, vmem_limit, n_buffers = _tpu_config()
    if block_n is None:
        block_n = max_tn

    ln_w2 = ln_weight.reshape(1, D).astype(jnp.float32)
    ln_b2 = ln_bias.reshape(1, D).astype(jnp.float32)

    # ---- modulation + LN-affine fold: one tiny pallas_call, run once ---------
    gamma_p, beta_p = pl.pallas_call(
        functools.partial(_modulation_kernel, gain=gain),
        out_shape=(jax.ShapeDtypeStruct((B, D), jnp.float32),
                   jax.ShapeDtypeStruct((B, D), jnp.float32)),
        compiler_params=pltpu.CompilerParams(vmem_limit_bytes=vmem_limit),
    )(w, wg, wb, ln_w2, ln_b2)

    # ---- streaming LN + affine, tiled over (batch, tokens) -------------------
    tn = min(block_n, N)
    # TODO(synk): if N % tn != 0 the padded rows of the last tile run rsqrt on
    # stale VMEM (masked stores keep the output correct, but NaN-trapping debug
    # configs may trip); pad N or pick tn | N in production. Same for D not a
    # multiple of 128 (masked vst.msk partial stores).
    grid = (B, pl.cdiv(N, tn))

    gb_spec = pl.BlockSpec((1, D), lambda b, j: (b, 0))         # per-batch row
    out_spec = pl.BlockSpec((pl.Squeezed(), tn, D), lambda b, j: (b, j, 0))

    return pl.pallas_call(
        functools.partial(_sln_kernel, eps=float(eps), inv_d=float(1.0 / D)),
        out_shape=jax.ShapeDtypeStruct((B, N, D), hidden.dtype),
        grid_spec=pltpu.PrefetchScalarGridSpec(
            num_scalar_prefetch=0,
            grid=grid,
            in_specs=[
                _hidden_block_spec(tn, D, n_buffers),           # hidden tile
                gb_spec,                                        # gamma' (B, D)
                gb_spec,                                        # beta'  (B, D)
            ],
            out_specs=out_spec,
        ),
        compiler_params=pltpu.CompilerParams(
            dimension_semantics=("parallel", "parallel"),
            vmem_limit_bytes=vmem_limit,
        ),
    )(hidden, gamma_p, beta_p)


def sln_reference(hidden, w, wg, wb, ln_weight, ln_bias, *, eps=1e-5):
    """Pure-JAX reference mirroring the PyTorch module."""
    D = hidden.shape[-1]
    gain = 1.0 / np.sqrt(D)
    gamma = (w @ (wg * gain).T)[:, None, :]
    beta = (w @ (wb * gain).T)[:, None, :]
    mean = jnp.mean(hidden, axis=-1, keepdims=True)
    var = jnp.mean((hidden - mean) ** 2, axis=-1, keepdims=True)
    ln = (hidden - mean) * lax.rsqrt(var + eps) * ln_weight + ln_bias
    return gamma * ln + beta


if __name__ == "__main__":
    B, N, D = 2, 8, 32   # input_size = parameter_size = D

    key = jax.random.PRNGKey(0)
    k_h, k_w, k_wg, k_wb, k_lw, k_lb = jax.random.split(key, 6)

    hidden = jax.random.normal(k_h, (B, N, D), dtype=jnp.float32)
    w_latent = jax.random.normal(k_w, (B, D), dtype=jnp.float32)

    # FullyConnectedLayer weights: torch.randn([out, in]) / lr_multiplier
    wg = jax.random.normal(k_wg, (D, D), dtype=jnp.float32)
    wb = jax.random.normal(k_wb, (D, D), dtype=jnp.float32)
    # LayerNorm affine params (non-trivial values to exercise the gamma'/beta' fold)
    ln_weight = 1.0 + 0.1 * jax.random.normal(k_lw, (D,), dtype=jnp.float32)
    ln_bias = 0.1 * jax.random.normal(k_lb, (D,), dtype=jnp.float32)

    out = sln_forward(hidden, w_latent, wg, wb, ln_weight, ln_bias)
    out = jax.block_until_ready(out)

    ref = sln_reference(hidden, w_latent, wg, wb, ln_weight, ln_bias)
    # atol slightly above 1e-5: single-pass variance differs from the two-pass
    # reference by a few ulps, scaled by |gamma| (all f32).
    np.testing.assert_allclose(np.asarray(out), np.asarray(ref),
                               rtol=1e-5, atol=5e-5)
    print("KERNEL_OK")
</pallas_src>

<mosaic_0001>
module attributes {stable_mosaic.version = 11 : i64} {
  func.func @_modulation_kernel(%arg0: memref<2x32xf32, #tpu.memory_space<vmem>>, %arg1: memref<32x32xf32, #tpu.memory_space<vmem>>, %arg2: memref<32x32xf32, #tpu.memory_space<vmem>>, %arg3: memref<1x32xf32, #tpu.memory_space<vmem>>, %arg4: memref<1x32xf32, #tpu.memory_space<vmem>>, %arg5: memref<2x32xf32, #tpu.memory_space<vmem>>, %arg6: memref<2x32xf32, #tpu.memory_space<vmem>>) attributes {dimension_semantics = [], scalar_prefetch = 0 : i64, scratch_operands = 0 : i64, tpu.core_type = #tpu.core_type<tc>} {
    %c0 = arith.constant 0 : index
    %c0_0 = arith.constant 0 : index
    %0 = vector.load %arg0[%c0, %c0_0] : memref<2x32xf32, #tpu.memory_space<vmem>>, vector<2x32xf32>
    %c0_1 = arith.constant 0 : index
    %c0_2 = arith.constant 0 : index
    %1 = vector.load %arg1[%c0_1, %c0_2] : memref<32x32xf32, #tpu.memory_space<vmem>>, vector<32x32xf32>
    %cst = arith.constant dense<0.000000e+00> : vector<2x32xf32>
    %2 = tpu.matmul %0, %1, %cst {dimension_numbers = #tpu.dot_dimension_numbers<[1], [1], [0], [0], [0, 0, 1, 0], [], []>} : vector<2x32xf32>, vector<32x32xf32>, vector<2x32xf32> -> vector<2x32xf32>
    %cst_3 = arith.constant 0.176776692 : f32
    %3 = vector.broadcast %cst_3 : f32 to vector<2x32xf32>
    %4 = arith.mulf %2, %3 : vector<2x32xf32>
    %c0_4 = arith.constant 0 : index
    %c0_5 = arith.constant 0 : index
    %5 = vector.load %arg2[%c0_4, %c0_5] : memref<32x32xf32, #tpu.memory_space<vmem>>, vector<32x32xf32>
    %cst_6 = arith.constant dense<0.000000e+00> : vector<2x32xf32>
    %6 = tpu.matmul %0, %5, %cst_6 {dimension_numbers = #tpu.dot_dimension_numbers<[1], [1], [0], [0], [0, 0, 1, 0], [], []>} : vector<2x32xf32>, vector<32x32xf32>, vector<2x32xf32> -> vector<2x32xf32>
    %cst_7 = arith.constant 0.176776692 : f32
    %7 = vector.broadcast %cst_7 : f32 to vector<2x32xf32>
    %8 = arith.mulf %6, %7 : vector<2x32xf32>
    %c0_8 = arith.constant 0 : index
    %c0_9 = arith.constant 0 : index
    %9 = vector.load %arg3[%c0_8, %c0_9] : memref<1x32xf32, #tpu.memory_space<vmem>>, vector<1x32xf32>
    %c0_10 = arith.constant 0 : index
    %c0_11 = arith.constant 0 : index
    %10 = vector.load %arg4[%c0_10, %c0_11] : memref<1x32xf32, #tpu.memory_space<vmem>>, vector<1x32xf32>
    %11 = vector.broadcast %9 : vector<1x32xf32> to vector<2x32xf32>
    %12 = arith.mulf %4, %11 : vector<2x32xf32>
    %c0_12 = arith.constant 0 : index
    %c0_13 = arith.constant 0 : index
    %13 = vector.load %arg5[%c0_12, %c0_13] : memref<2x32xf32, #tpu.memory_space<vmem>>, vector<2x32xf32>
    tpu.vector_store %arg5[%c0_12, %c0_13], %12 {strides = array<i32>} : memref<2x32xf32, #tpu.memory_space<vmem>>, vector<2x32xf32>,
    %14 = vector.broadcast %10 : vector<1x32xf32> to vector<2x32xf32>
    %15 = arith.mulf %4, %14 : vector<2x32xf32>
    %16 = arith.addf %15, %8 : vector<2x32xf32>
    %c0_14 = arith.constant 0 : index
    %c0_15 = arith.constant 0 : index
    %17 = vector.load %arg6[%c0_14, %c0_15] : memref<2x32xf32, #tpu.memory_space<vmem>>, vector<2x32xf32>
    tpu.vector_store %arg6[%c0_14, %c0_15], %16 {strides = array<i32>} : memref<2x32xf32, #tpu.memory_space<vmem>>, vector<2x32xf32>,
    return
  }
}

</mosaic_0001>

<bundles_post_ra>
// kernel: tpu_custom_call.1
= control target key start
LH: loop header
LB: loop body
LE: loop exit
PB: predicated region body
PF: predicated region fallthrough
CT: control target
= control target key end

     0   :  { %12 = vsyncpa [#allocation3], 0  ;;  %s615_s0 = inlined_call_operand.hbm [shape: f32[2,32], index: 0, kind: input, shape index: {}]   ;;  %s616_s1 = inlined_call_operand.hbm [shape: f32[32,32], index: 1, kind: input, shape index: {}]   ;;  %s617_s2 = inlined_call_operand.hbm [shape: f32[32,32], index: 2, kind: input, shape index: {}]   ;;  %s618_s3 = inlined_call_operand.vmem [shape: f32[1,32], index: 3, kind: input, shape index: {}]   ;;  %s619_s4 = inlined_call_operand.vmem [shape: f32[1,32], index: 4, kind: input, shape index: {}]   ;;  %s620_s5 = inlined_call_operand.hbm [shape: f32[2,32], index: 5, kind: output, shape index: {0}]   ;;  %s621_s6 = inlined_call_operand.hbm [shape: f32[2,32], index: 6, kind: output, shape index: {1}]  }
   0x1   :  { %13 = vsyncpa [#allocation6], 0 }
   0x2   :  { %14 = vsyncpa [#allocation4], 0 }
   0x3   :  { %15 = vsyncpa [#allocation10], 0  ;;  %s480_s21 = smov [#allocation5]   ;;  %s362_s25 = scalar_lea.hbm %s616_s1, 512 }
   0x4   :  { %s31_s22 = sshll.u32 %s480_s21, 4  ;;  %p363_p0 = scmp.ne.s32.totalorder %s616_s1, %s362_s25  ;;  %s32_s22 = int_to_ptr.vmem [resolvable:$true] %s31_s22 }
   0x5   :  { %p366_p1 = scmp.lt.u32.totalorder %s362_s25, %s616_s1 }
   0x7   :  { %p368_p2 = pnand %p366_p1, %p363_p0 }
   0x9   :  { %371 = shalt.err (!%p368_p2)
}
   0xa   :  { %s372_s30 = scalar_lea.vmem %s32_s22, 512  ;;  %p377_p4 = scmp.lt.s32.totalorder %s32_s22, %s32_s22 }
   0xb   :  { %p373_p3 = scmp.ne.s32.totalorder %s32_s22, %s372_s30  ;;  %p378_p5 = scmp.lt.s32.totalorder %s372_s30, %s372_s30 }
   0xd   :  { %p379_p6 = por %p378_p5, %p377_p4 }
   0xf   :  { %p380_p7 = pnand %p379_p6, %p373_p3 }
  0x11   :  { %383 = shalt.err (!%p380_p7)
}
  0x12   :  { %s481_s7 = smov 128   ;;  %s482_s8 = smov 8  }
  0x13   :  { %37 = dma.hbm_to_vmem [thread:$0]  %s616_s1, 512, %s32_s22, [#allocation6], %s481_s7, %s481_s7, %s482_s8  }
  0x14   :  { %s483_s11 = smov [#allocation2]   ;;  %s484_s13 = smov [#allocation7]  }
  0x15   :  { %s22_s12 = sshll.u32 %s483_s11, 4  ;;  %s43_s14 = sshll.u32 %s484_s13, 4  ;;  %s23_s12 = int_to_ptr.vmem [resolvable:$true] %s22_s12  ;;  %s44_s14 = int_to_ptr.vmem [resolvable:$true] %s43_s14 }
  0x16   :  { %s384_s17 = scalar_lea.hbm %s615_s0, 32 }
  0x17   :  { %p385_p8 = scmp.ne.s32.totalorder %s615_s0, %s384_s17  ;;  %p388_p9 = scmp.lt.u32.totalorder %s384_s17, %s615_s0 }
  0x19   :  { %p390_p10 = pnand %p388_p9, %p385_p8 }
  0x1b   :  { %393 = shalt.err (!%p390_p10)
}
  0x1c   :  { %s394_s1 = scalar_lea.vmem %s23_s12, 32  ;;  %p399_p12 = scmp.lt.s32.totalorder %s23_s12, %s23_s12 }
  0x1d   :  { %p395_p11 = scmp.ne.s32.totalorder %s23_s12, %s394_s1  ;;  %p400_p13 = scmp.lt.s32.totalorder %s394_s1, %s394_s1 }
  0x1f   :  { %p401_p0 = por %p400_p13, %p399_p12 }
  0x21   :  { %p402_p1 = pnand %p401_p0, %p395_p11 }
  0x23   :  { %405 = shalt.err (!%p402_p1)
}
  0x24   :  { %25 = dma.hbm_to_vmem [thread:$0]  %s615_s0, 32, %s23_s12, [#allocation3]  }
  0x25   :  { %s406_s26 = scalar_lea.hbm %s617_s2, 512 }
  0x26   :  { %p407_p2 = scmp.ne.s32.totalorder %s617_s2, %s406_s26  ;;  %p410_p3 = scmp.lt.u32.totalorder %s406_s26, %s617_s2 }
  0x28   :  { %p412_p4 = pnand %p410_p3, %p407_p2 }
  0x2a   :  { %415 = shalt.err (!%p412_p4)
}
  0x2b   :  { %s416_s9 = scalar_lea.vmem %s44_s14, 512  ;;  %p421_p6 = scmp.lt.s32.totalorder %s44_s14, %s44_s14 }
  0x2c   :  { %p417_p5 = scmp.ne.s32.totalorder %s44_s14, %s416_s9  ;;  %p422_p7 = scmp.lt.s32.totalorder %s416_s9, %s416_s9 }
  0x2e   :  { %p423_p8 = por %p422_p7, %p421_p6 }
  0x30   :  { %p424_p9 = pnand %p423_p8, %p417_p5 }
  0x32   :  { %427 = shalt.err (!%p424_p9)
}
  0x33   :  { %49 = dma.hbm_to_vmem [thread:$0]  %s617_s2, 512, %s44_s14, [#allocation6], %s481_s7, %s481_s7, %s482_s8  }
  0x34   :  { %472 = dma.done.wait [#allocation3], 32  }
  0x35   :  { %473 = vsyncadd [#allocation3], 4294967264 }
  0x36   :  { %474 = dma.done.wait [#allocation6], 1024  }
  0x37   :  { %475 = vsyncadd [#allocation6], 4294966272  ;;  %v485_v0 = vmov 0.0|0.0   ;;  %vm486_vm0 = vmmov 0   ;;  %v487_v1 = vmov 0.0   ;;  %vm68_vm1 = vcmask 261120  }
  0x38   :  { %336 = vmatprep.subr.bf16.mxu0 %v485_v0  ;;  %344 = vmatprep.subr.bf16.mxu1 %v485_v0  ;;  %vm569_vm2 = vmpackc.low %vm68_vm1, %vm68_vm1  ;;  %v64_v3 = vld [vmem:[#allocation5] sm:$0xff]  ;;  %v65_v4 = vld [vmem:[#allocation5 + $0x8] sm:$0xff]  ;;  %s488_s12 = smov [#allocation8]   ;;  %vm251_vm3 = vcmask 254976   ;;  %s489_s14 = smov [#allocation9]  }
  0x39   :  { %322 = vmatprep.mubr.msk.f32.mxu0 %vm486_vm0, %v487_v1  ;;  %333 = vmatprep.mubr.msk.f32.mxu1 %vm486_vm0, %v487_v1  ;;  %v155_v5 = vld [vmem:[#allocation7] sm:$0xff]  ;;  %v337_v6 = vpack.c.bf16 %v65_v4, %v64_v3  ;;  %v156_v7 = vld [vmem:[#allocation7 + $0x8] sm:$0xff]  ;;  %v66_v9 = vld [vmem:[#allocation5 + $0x10] sm:$0xff]  ;;  %s268_s13 = sshll.u32 %s488_s12, 4  ;;  %s278_s15 = sshll.u32 %s489_s14, 4  ;;  %s269_s13 = int_to_ptr.vmem [resolvable:$true] %s268_s13  ;;  %s279_s15 = int_to_ptr.vmem [resolvable:$true] %s278_s15 }
  0x3a   :  { %v345_v8 = vpack.c.bf16 %v156_v7, %v155_v5  ;;  %v67_v10 = vld [vmem:[#allocation5 + $0x18] sm:$0xff]  ;;  %v157_v11 = vld [vmem:[#allocation7 + $0x10] sm:$0xff]  ;;  %p433_p11 = scmp.lt.s32.totalorder %s269_s13, %s269_s13 }
  0x3b   :  { %339 = vmatpush3.bf16.xpose.msk.msra.mxu0 %vm569_vm2, %v337_v6  ;;  %v158_v12 = vld [vmem:[#allocation7 + $0x18] sm:$0xff]  ;;  %v341_v13 = vpack.c.bf16 %v67_v10, %v66_v9 }
  0x3c   :  { %347 = vmatpush3.bf16.xpose.msk.msra.mxu1 %vm569_vm2, %v345_v8  ;;  %340 = vmatprep.subr.bf16.mxu0 %v485_v0  ;;  %v349_v14 = vpack.c.bf16 %v158_v12, %v157_v11  ;;  %v63_v15 = vld [vmem:[#allocation2] sm:$0x3] }
  0x3d   :  { %348 = vmatprep.subr.bf16.mxu1 %v485_v0  ;;  %v302_v17 = vld [vmem:[%s618_s3] ss:$0 sm:$0xff]  ;;  %s428_s3 = scalar_lea.vmem %s269_s13, 32 }
  0x3e   :  { %v303_v18 = vld [vmem:[%s619_s4] ss:$0 sm:$0xff]  ;;  %p429_p10 = scmp.ne.s32.totalorder %s269_s13, %s428_s3  ;;  %p434_p12 = scmp.lt.s32.totalorder %s428_s3, %s428_s3 }
  0x40   :  { %p435_p13 = por %p434_p12, %p433_p11 }
  0x42   :  { %p436_p0 = pnand %p435_p13, %p429_p10 }
  0x43   :  { %343 = vmatpush3.bf16.xpose.msk.msra.mxu0 %vm569_vm2, %v341_v13 }
  0x44   :  { %351 = vmatpush3.bf16.xpose.msk.msra.mxu1 %vm569_vm2, %v349_v14 }
  0x4a   :  { %323 = vmatmul.mubr.msk.f32.vlgmr.msra.gmra.mrb[0].mxu0 %vm68_vm1, %v63_v15 }
  0x4b   :  { %334 = vmatmul.mubr.msk.f32.vlgmr.msra.gmra.mrb[0].mxu1 %vm68_vm1, %v63_v15 }
 0x11d   :  { %v150_v16 = vpop.f32.mrb[0].mxu0 }
 0x11e   :  { %v154_v19 = vmul.f32 0.17677669, %v150_v16  ;;  %v324_v20 = vpop.f32.mrb[1].mxu0  ;;  %v237_v21 = vpop.f32.mrb[0].mxu1 }
 0x11f   :  { %v241_v22 = vmul.f32 0.17677669, %v237_v21  ;;  %v335_v23 = vpop.f32.mrb[1].mxu1 }
 0x120   :  { %v250_v24 = vmul.f32 %v302_v17, %v154_v19  ;;  %v259_v25 = vmul.f32 %v303_v18, %v154_v19 }
 0x122   :  { %v260_v26 = vadd.f32 %v259_v25, %v241_v22  ;;  %252 = vst.msk [vmem:[#allocation8] sm:$0x3] %vm251_vm3, %v250_v24 }
 0x123   :  { %439 = shalt.err (!%p436_p0)
}
 0x124   :  { %s440_s17 = scalar_lea.hbm %s620_s5, 32 }
 0x125   :  { %p441_p1 = scmp.ne.s32.totalorder %s620_s5, %s440_s17  ;;  %p444_p2 = scmp.lt.u32.totalorder %s440_s17, %s620_s5 }
 0x127   :  { %p446_p3 = pnand %p444_p2, %p441_p1 }
 0x129   :  { %449 = shalt.err (!%p446_p3)
}
 0x12a   :  { %271 = dma.vmem_to_hbm [thread:$0]  %s269_s13, 32, %s620_s5, [#allocation4]   ;;  %261 = vst.msk [vmem:[#allocation9] sm:$0x3] %vm251_vm3, %v260_v26 }
 0x12b   :  { %s450_s23 = scalar_lea.vmem %s279_s15, 32  ;;  %p455_p5 = scmp.lt.s32.totalorder %s279_s15, %s279_s15 }
 0x12c   :  { %p451_p4 = scmp.ne.s32.totalorder %s279_s15, %s450_s23  ;;  %p456_p6 = scmp.lt.s32.totalorder %s450_s23, %s450_s23 }
 0x12e   :  { %p457_p7 = por %p456_p6, %p455_p5 }
 0x130   :  { %p458_p8 = pnand %p457_p7, %p451_p4 }
 0x132   :  { %461 = shalt.err (!%p458_p8)
}
 0x133   :  { %s462_s26 = scalar_lea.hbm %s621_s6, 32 }
 0x134   :  { %p463_p9 = scmp.ne.s32.totalorder %s621_s6, %s462_s26  ;;  %p466_p10 = scmp.lt.u32.totalorder %s462_s26, %s621_s6 }
 0x136   :  { %p468_p11 = pnand %p466_p10, %p463_p9 }
 0x138   :  { %471 = shalt.err (!%p468_p11)
}
 0x139   :  { %281 = dma.vmem_to_hbm [thread:$0]  %s279_s15, 32, %s621_s6, [#allocation10]  }
 0x13a   :  { %476 = dma.done.wait [#allocation4], 32  }
 0x13b   :  { %477 = vsyncadd [#allocation4], 4294967264 }
 0x13c   :  { %478 = dma.done.wait [#allocation10], 32  }
 0x13d   :  { %479 = vsyncadd [#allocation10], 4294967264 }
 0x13e   :  { %288 = vsyncpa [#allocation3], 1 }
 0x13f   :  { %289 = vsyncpa [#allocation6], 1 }
 0x140   :  { %290 = vsyncpa [#allocation4], 1 }
 0x141   :  { %291 = vsyncpa [#allocation10], 1 }

</bundles_post_ra>
